<compile_context>
chip_gen: v5e
topology: v5e:2x2
jax: 0.10.0
libtpu: 0.0.40
codegen_flags: <defaults>
</compile_context>

<pallas_src>
import math
import jax
import jax.numpy as jnp
from jax import lax
from jax.experimental import pallas as pl
from jax.experimental.pallas import tpu as pltpu

D_MODEL = 32
N_HEADS = 4
D_FF = 64
EPS = 1e-6  # LayerNormalization eps


def _layernorm(x, alpha, bias):
    # torch: mean over last dim; torch.std is UNBIASED (divides by D-1).
    # Variance via E[x^2] - mean^2 so the two XLU reductions issue independently
    # (review item 7); clamp at 0 to guard cancellation.
    d = x.shape[-1]
    mean = jnp.mean(x, axis=-1, keepdims=True)
    ex2 = jnp.mean(x * x, axis=-1, keepdims=True)
    var = (ex2 - mean * mean) * (d / (d - 1.0))
    std = jnp.sqrt(jnp.maximum(var, 0.0))
    return alpha * (x - mean) / (std + EPS) + bias


def _make_kernel(batch, seq, d_model, n_heads):
    dk = d_model // n_heads
    scale = 1.0 / math.sqrt(dk)

    def kernel(ln_ref, x_ref, wqkv_ref, bqkv_ref, wo_ref, bo_ref,
               w1_ref, b1_ref, w2_ref, b2_ref, o_ref):
        x = x_ref[...]                                   # (B*S, D) -- whole problem in VMEM
        # LayerNorm scalar params from SMEM: [alpha1, bias1, alpha2, bias2]
        a1 = ln_ref[0]
        c1 = ln_ref[1]
        a2 = ln_ref[2]
        c2 = ln_ref[3]

        # ---- residual connection 0: self-attention on LayerNorm(x) ----
        xn = _layernorm(x, a1, c1)

        # Fused QKV projection: single MXU push with 3*D output lanes (review item 5).
        qkv = jnp.dot(xn, wqkv_ref[...],
                      preferred_element_type=jnp.float32) + bqkv_ref[...]   # (B*S, 3D)
        # (B*S, 3D) -> (B, S, 3D): sublane-only split, free.
        qkv3 = qkv.reshape(batch, seq, 3 * d_model)

        # Head-outer loop; each head issues two B-batched dots (review item 1).
        ctx_heads = []
        for h in range(n_heads):                          # static loop (H=4)
            q_h = qkv3[:, :, h * dk:(h + 1) * dk]                                  # (B,S,dk)
            k_h = qkv3[:, :, d_model + h * dk: d_model + (h + 1) * dk]             # (B,S,dk)
            v_h = qkv3[:, :, 2 * d_model + h * dk: 2 * d_model + (h + 1) * dk]     # (B,S,dk)
            # scores[b,i,j] = sum_d q[b,i,d] * k[b,j,d]  (no explicit transpose)
            scores = jnp.einsum('bqd,bkd->bqk', q_h, k_h,
                                preferred_element_type=jnp.float32) * scale        # (B,S,S)
            scores = scores - jnp.max(scores, axis=-1, keepdims=True)
            p = jnp.exp(scores)
            p = p / jnp.sum(p, axis=-1, keepdims=True)    # exact divide (review item 10)
            ctx = jnp.einsum('bqk,bkd->bqd', p, v_h,
                             preferred_element_type=jnp.float32)                   # (B,S,dk)
            ctx_heads.append(ctx)

        # Assemble the 4 head contexts into the 32 lanes of one (B*S, D) buffer and do a
        # single K=32 output projection (review item 2); bias + residual folded in
        # (review item 6).
        ctx_all = jnp.concatenate(ctx_heads, axis=-1).reshape(batch * seq, d_model)
        x1 = x + jnp.dot(ctx_all, wo_ref[...],
                         preferred_element_type=jnp.float32) + bo_ref[...]          # (B*S, D)

        # ---- residual connection 1: feed-forward on LayerNorm(x1) ----
        xn2 = _layernorm(x1, a2, c2)
        hid = jnp.maximum(
            jnp.dot(xn2, w1_ref[...], preferred_element_type=jnp.float32) + b1_ref[...],
            0.0)
        ff = jnp.dot(hid, w2_ref[...], preferred_element_type=jnp.float32) + b2_ref[...]

        o_ref[...] = x1 + ff                              # single lane-contiguous store
        # TODO(synk): output last dim is 32 lanes (module-defined d_model); for larger
        # models keep it a multiple of 128 or fuse more work per pallas_call.

    return kernel


def prepare_params(params):
    """One-time parameter preparation (hoisted out of the hot path, review item 8)."""
    return {
        "ln": params["ln"].reshape(4),   # [alpha1, bias1, alpha2, bias2]
        "wqkv": jnp.concatenate([params["wq"], params["wk"], params["wv"]], axis=1),
        "bqkv": jnp.concatenate([params["bq"], params["bk"], params["bv"]], axis=1),
        "wo": params["wo"], "bo": params["bo"],
        "w1": params["w1"], "b1": params["b1"],
        "w2": params["w2"], "b2": params["b2"],
    }


def encoder_block(x, prepped):
    B, S, D = x.shape
    assert D == D_MODEL
    x2d = x.reshape(B * S, D)                             # wrapper-side reshape (free)

    vmem = pl.BlockSpec(memory_space=pltpu.MemorySpace.VMEM)
    smem = pl.BlockSpec(memory_space=pltpu.MemorySpace.SMEM)

    H, F = N_HEADS, D_FF
    flops = (2 * B * S * D * 3 * D            # fused QKV
             + 2 * B * S * S * D * 2          # scores + ctx over all heads
             + 2 * B * S * D * D              # output projection
             + 2 * B * S * D * F * 2)         # FFN
    bytes_accessed = 4 * (2 * B * S * D + 3 * D * D + D * D + 2 * D * F
                          + 3 * D + D + F + D + 4)
    cost = pl.CostEstimate(flops=flops,
                           transcendentals=B * H * S * S,
                           bytes_accessed=bytes_accessed)

    kernel = _make_kernel(B, S, D, N_HEADS)
    out2d = pl.pallas_call(
        kernel,
        out_shape=jax.ShapeDtypeStruct((B * S, D), jnp.float32),
        in_specs=[smem, vmem, vmem, vmem, vmem, vmem, vmem, vmem, vmem, vmem],
        out_specs=vmem,
        cost_estimate=cost,
    )(prepped["ln"], x2d, prepped["wqkv"], prepped["bqkv"],
      prepped["wo"], prepped["bo"],
      prepped["w1"], prepped["b1"],
      prepped["w2"], prepped["b2"])
    return out2d.reshape(B, S, D)


def reference_forward(x, p):
    """Pure-JAX reference mirroring the PyTorch module (eval mode, mask=None)."""
    def ln(t, alpha, bias):
        d = t.shape[-1]
        mean = t.mean(-1, keepdims=True)
        var = ((t - mean) ** 2).sum(-1, keepdims=True) / (d - 1)
        return alpha * (t - mean) / (jnp.sqrt(var) + EPS) + bias

    B, S, D = x.shape
    h, dk = N_HEADS, D // N_HEADS
    a1, c1, a2, c2 = [p["ln"][0, i] for i in range(4)]

    xn = ln(x, a1, c1)
    q = xn @ p["wq"] + p["bq"]
    k = xn @ p["wk"] + p["bk"]
    v = xn @ p["wv"] + p["bv"]
    qh = q.reshape(B, S, h, dk).transpose(0, 2, 1, 3)
    kh = k.reshape(B, S, h, dk).transpose(0, 2, 1, 3)
    vh = v.reshape(B, S, h, dk).transpose(0, 2, 1, 3)
    scores = (qh @ kh.transpose(0, 1, 3, 2)) / math.sqrt(dk)
    pattn = jax.nn.softmax(scores, axis=-1)
    o = (pattn @ vh).transpose(0, 2, 1, 3).reshape(B, S, D)
    x1 = x + (o @ p["wo"] + p["bo"])

    xn2 = ln(x1, a2, c2)
    ff = jnp.maximum(xn2 @ p["w1"] + p["b1"], 0.0) @ p["w2"] + p["b2"]
    return x1 + ff


def init_params(key):
    ks = jax.random.split(key, 12)

    def lin(kw, fan_in, fan_out):
        bound = 1.0 / math.sqrt(fan_in)
        return jax.random.uniform(kw, (fan_in, fan_out), jnp.float32, -bound, bound)

    D, F = D_MODEL, D_FF
    params = {
        "wq": lin(ks[0], D, D), "bq": jnp.zeros((1, D), jnp.float32),
        "wk": lin(ks[1], D, D), "bk": jnp.zeros((1, D), jnp.float32),
        "wv": lin(ks[2], D, D), "bv": jnp.zeros((1, D), jnp.float32),
        "wo": lin(ks[3], D, D), "bo": jnp.zeros((1, D), jnp.float32),
        "w1": lin(ks[4], D, F),
        "b1": 0.01 * jax.random.normal(ks[5], (1, F), jnp.float32),
        "w2": lin(ks[6], F, D),
        "b2": 0.01 * jax.random.normal(ks[7], (1, D), jnp.float32),
        # LayerNormalization params: alpha init 1, bias init 0 (two instances).
        "ln": jnp.array([[1.0, 0.0, 1.0, 0.0]], jnp.float32),
    }
    return params
    # TODO(synk): dropout is modelled as identity (eval mode); stochastic training
    # dropout (including the pre-softmax dropout quirk) is not implemented.


if __name__ == "__main__":
    key = jax.random.PRNGKey(0)
    k_x, k_p = jax.random.split(key)
    B, S = 2, 8
    x = jax.random.normal(k_x, (B, S, D_MODEL), jnp.float32)
    params = init_params(k_p)
    prepped = prepare_params(params)      # one-time param prep (fused QKV, flat LN scalars)

    out = encoder_block(x, prepped)
    out = jax.block_until_ready(out)

    ref = reference_forward(x, params)
    assert out.shape == (B, S, D_MODEL)
    err = jnp.max(jnp.abs(out - ref))
    # Exact softmax divide restored -> tight tolerance (review item 10).
    assert jnp.allclose(out, ref, atol=1e-4, rtol=1e-4), f"max abs err = {err}"

    print("KERNEL_OK")
</pallas_src>

<mosaic_0001>
module attributes {stable_mosaic.version = 11 : i64} {
  func.func @kernel(%arg0: memref<4xf32, #tpu.memory_space<smem>>, %arg1: memref<16x32xf32, #tpu.memory_space<vmem>>, %arg2: memref<32x96xf32, #tpu.memory_space<vmem>>, %arg3: memref<1x96xf32, #tpu.memory_space<vmem>>, %arg4: memref<32x32xf32, #tpu.memory_space<vmem>>, %arg5: memref<1x32xf32, #tpu.memory_space<vmem>>, %arg6: memref<32x64xf32, #tpu.memory_space<vmem>>, %arg7: memref<1x64xf32, #tpu.memory_space<vmem>>, %arg8: memref<64x32xf32, #tpu.memory_space<vmem>>, %arg9: memref<1x32xf32, #tpu.memory_space<vmem>>, %arg10: memref<16x32xf32, #tpu.memory_space<vmem>>) attributes {dimension_semantics = [], scalar_prefetch = 0 : i64, scratch_operands = 0 : i64, tpu.core_type = #tpu.core_type<tc>} {
    %c0 = arith.constant 0 : index
    %c0_0 = arith.constant 0 : index
    %0 = vector.load %arg1[%c0, %c0_0] : memref<16x32xf32, #tpu.memory_space<vmem>>, vector<16x32xf32>
    %c0_1 = arith.constant 0 : index
    %1 = memref.load %arg0[%c0_1] : memref<4xf32, #tpu.memory_space<smem>>
    %c1 = arith.constant 1 : index
    %2 = memref.load %arg0[%c1] : memref<4xf32, #tpu.memory_space<smem>>
    %c2 = arith.constant 2 : index
    %3 = memref.load %arg0[%c2] : memref<4xf32, #tpu.memory_space<smem>>
    %c3 = arith.constant 3 : index
    %4 = memref.load %arg0[%c3] : memref<4xf32, #tpu.memory_space<smem>>
    %cst = arith.constant dense<0.000000e+00> : vector<16xf32>
    %5 = vector.multi_reduction <add>, %0, %cst [1] : vector<16x32xf32> to vector<16xf32>
    %6 = vector.shape_cast %5 : vector<16xf32> to vector<16x1xf32>
    %cst_2 = arith.constant 3.200000e+01 : f32
    %7 = vector.broadcast %cst_2 : f32 to vector<16x1xf32>
    %8 = arith.divf %6, %7 : vector<16x1xf32>
    %9 = arith.mulf %0, %0 : vector<16x32xf32>
    %cst_3 = arith.constant dense<0.000000e+00> : vector<16xf32>
    %10 = vector.multi_reduction <add>, %9, %cst_3 [1] : vector<16x32xf32> to vector<16xf32>
    %11 = vector.shape_cast %10 : vector<16xf32> to vector<16x1xf32>
    %cst_4 = arith.constant 3.200000e+01 : f32
    %12 = vector.broadcast %cst_4 : f32 to vector<16x1xf32>
    %13 = arith.divf %11, %12 : vector<16x1xf32>
    %14 = arith.mulf %8, %8 : vector<16x1xf32>
    %15 = arith.subf %13, %14 : vector<16x1xf32>
    %cst_5 = arith.constant 1.03225803 : f32
    %16 = vector.broadcast %cst_5 : f32 to vector<16x1xf32>
    %17 = arith.mulf %15, %16 : vector<16x1xf32>
    %cst_6 = arith.constant 0.000000e+00 : f32
    %18 = vector.broadcast %cst_6 : f32 to vector<16x1xf32>
    %19 = arith.maximumf %17, %18 : vector<16x1xf32>
    %20 = math.sqrt %19 : vector<16x1xf32>
    %21 = vector.broadcast %8 : vector<16x1xf32> to vector<16x32xf32>
    %22 = arith.subf %0, %21 : vector<16x32xf32>
    %23 = vector.broadcast %1 : f32 to vector<16x32xf32>
    %24 = arith.mulf %23, %22 : vector<16x32xf32>
    %cst_7 = arith.constant 9.99999997E-7 : f32
    %25 = vector.broadcast %cst_7 : f32 to vector<16x1xf32>
    %26 = arith.addf %20, %25 : vector<16x1xf32>
    %27 = vector.broadcast %26 : vector<16x1xf32> to vector<16x32xf32>
    %28 = arith.divf %24, %27 : vector<16x32xf32>
    %29 = vector.broadcast %2 : f32 to vector<16x32xf32>
    %30 = arith.addf %28, %29 : vector<16x32xf32>
    %c0_8 = arith.constant 0 : index
    %c0_9 = arith.constant 0 : index
    %31 = vector.load %arg2[%c0_8, %c0_9] : memref<32x96xf32, #tpu.memory_space<vmem>>, vector<32x96xf32>
    %cst_10 = arith.constant dense<0.000000e+00> : vector<16x96xf32>
    %32 = tpu.matmul %30, %31, %cst_10 {dimension_numbers = #tpu.dot_dimension_numbers<[1], [0], [0], [1], [0, 0, 1, 1], [], []>} : vector<16x32xf32>, vector<32x96xf32>, vector<16x96xf32> -> vector<16x96xf32>
    %c0_11 = arith.constant 0 : index
    %c0_12 = arith.constant 0 : index
    %33 = vector.load %arg3[%c0_11, %c0_12] : memref<1x96xf32, #tpu.memory_space<vmem>>, vector<1x96xf32>
    %34 = vector.broadcast %33 : vector<1x96xf32> to vector<16x96xf32>
    %35 = arith.addf %32, %34 : vector<16x96xf32>
    %36 = vector.shape_cast %35 : vector<16x96xf32> to vector<2x8x96xf32>
    %37 = vector.extract_strided_slice %36 {offsets = [0, 0, 0], sizes = [2, 8, 8], strides = [1, 1, 1]} : vector<2x8x96xf32> to vector<2x8x8xf32>
    %38 = vector.extract_strided_slice %36 {offsets = [0, 0, 32], sizes = [2, 8, 8], strides = [1, 1, 1]} : vector<2x8x96xf32> to vector<2x8x8xf32>
    %39 = vector.extract_strided_slice %36 {offsets = [0, 0, 64], sizes = [2, 8, 8], strides = [1, 1, 1]} : vector<2x8x96xf32> to vector<2x8x8xf32>
    "tpu.trace_start"() <{level = 10 : i32, message = "bqd,bkd->bqk"}> : () -> ()
    %cst_13 = arith.constant dense<0.000000e+00> : vector<2x8x8xf32>
    %40 = tpu.matmul %37, %38, %cst_13 {dimension_numbers = #tpu.dot_dimension_numbers<[2], [2], [1], [1], [0, 0, 0, 1, 1, 1], [0], [0]>} : vector<2x8x8xf32>, vector<2x8x8xf32>, vector<2x8x8xf32> -> vector<2x8x8xf32>
    "tpu.trace_stop"() : () -> ()
    %cst_14 = arith.constant 0.353553385 : f32
    %41 = vector.broadcast %cst_14 : f32 to vector<2x8x8xf32>
    %42 = arith.mulf %40, %41 : vector<2x8x8xf32>
    %cst_15 = arith.constant dense<0xFF800000> : vector<2x8xf32>
    %43 = vector.multi_reduction <maximumf>, %42, %cst_15 [2] : vector<2x8x8xf32> to vector<2x8xf32>
    %44 = vector.shape_cast %43 : vector<2x8xf32> to vector<2x8x1xf32>
    %45 = vector.broadcast %44 : vector<2x8x1xf32> to vector<2x8x8xf32>
    %46 = arith.subf %42, %45 : vector<2x8x8xf32>
    %47 = math.exp %46 : vector<2x8x8xf32>
    %cst_16 = arith.constant dense<0.000000e+00> : vector<2x8xf32>
    %48 = vector.multi_reduction <add>, %47, %cst_16 [2] : vector<2x8x8xf32> to vector<2x8xf32>
    %49 = vector.shape_cast %48 : vector<2x8xf32> to vector<2x8x1xf32>
    %50 = vector.broadcast %49 : vector<2x8x1xf32> to vector<2x8x8xf32>
    %51 = arith.divf %47, %50 : vector<2x8x8xf32>
    "tpu.trace_start"() <{level = 10 : i32, message = "bqk,bkd->bqd"}> : () -> ()
    %cst_17 = arith.constant dense<0.000000e+00> : vector<2x8x8xf32>
    %52 = tpu.matmul %51, %39, %cst_17 {dimension_numbers = #tpu.dot_dimension_numbers<[2], [1], [1], [2], [0, 0, 0, 1, 1, 2], [0], [0]>} : vector<2x8x8xf32>, vector<2x8x8xf32>, vector<2x8x8xf32> -> vector<2x8x8xf32>
    "tpu.trace_stop"() : () -> ()
    %53 = vector.extract_strided_slice %36 {offsets = [0, 0, 8], sizes = [2, 8, 8], strides = [1, 1, 1]} : vector<2x8x96xf32> to vector<2x8x8xf32>
    %54 = vector.extract_strided_slice %36 {offsets = [0, 0, 40], sizes = [2, 8, 8], strides = [1, 1, 1]} : vector<2x8x96xf32> to vector<2x8x8xf32>
    %55 = vector.extract_strided_slice %36 {offsets = [0, 0, 72], sizes = [2, 8, 8], strides = [1, 1, 1]} : vector<2x8x96xf32> to vector<2x8x8xf32>
    "tpu.trace_start"() <{level = 10 : i32, message = "bqd,bkd->bqk"}> : () -> ()
    %cst_18 = arith.constant dense<0.000000e+00> : vector<2x8x8xf32>
    %56 = tpu.matmul %53, %54, %cst_18 {dimension_numbers = #tpu.dot_dimension_numbers<[2], [2], [1], [1], [0, 0, 0, 1, 1, 1], [0], [0]>} : vector<2x8x8xf32>, vector<2x8x8xf32>, vector<2x8x8xf32> -> vector<2x8x8xf32>
    "tpu.trace_stop"() : () -> ()
    %cst_19 = arith.constant 0.353553385 : f32
    %57 = vector.broadcast %cst_19 : f32 to vector<2x8x8xf32>
    %58 = arith.mulf %56, %57 : vector<2x8x8xf32>
    %cst_20 = arith.constant dense<0xFF800000> : vector<2x8xf32>
    %59 = vector.multi_reduction <maximumf>, %58, %cst_20 [2] : vector<2x8x8xf32> to vector<2x8xf32>
    %60 = vector.shape_cast %59 : vector<2x8xf32> to vector<2x8x1xf32>
    %61 = vector.broadcast %60 : vector<2x8x1xf32> to vector<2x8x8xf32>
    %62 = arith.subf %58, %61 : vector<2x8x8xf32>
    %63 = math.exp %62 : vector<2x8x8xf32>
    %cst_21 = arith.constant dense<0.000000e+00> : vector<2x8xf32>
    %64 = vector.multi_reduction <add>, %63, %cst_21 [2] : vector<2x8x8xf32> to vector<2x8xf32>
    %65 = vector.shape_cast %64 : vector<2x8xf32> to vector<2x8x1xf32>
    %66 = vector.broadcast %65 : vector<2x8x1xf32> to vector<2x8x8xf32>
    %67 = arith.divf %63, %66 : vector<2x8x8xf32>
    "tpu.trace_start"() <{level = 10 : i32, message = "bqk,bkd->bqd"}> : () -> ()
    %cst_22 = arith.constant dense<0.000000e+00> : vector<2x8x8xf32>
    %68 = tpu.matmul %67, %55, %cst_22 {dimension_numbers = #tpu.dot_dimension_numbers<[2], [1], [1], [2], [0, 0, 0, 1, 1, 2], [0], [0]>} : vector<2x8x8xf32>, vector<2x8x8xf32>, vector<2x8x8xf32> -> vector<2x8x8xf32>
    "tpu.trace_stop"() : () -> ()
    %69 = vector.extract_strided_slice %36 {offsets = [0, 0, 16], sizes = [2, 8, 8], strides = [1, 1, 1]} : vector<2x8x96xf32> to vector<2x8x8xf32>
    %70 = vector.extract_strided_slice %36 {offsets = [0, 0, 48], sizes = [2, 8, 8], strides = [1, 1, 1]} : vector<2x8x96xf32> to vector<2x8x8xf32>
    %71 = vector.extract_strided_slice %36 {offsets = [0, 0, 80], sizes = [2, 8, 8], strides = [1, 1, 1]} : vector<2x8x96xf32> to vector<2x8x8xf32>
    "tpu.trace_start"() <{level = 10 : i32, message = "bqd,bkd->bqk"}> : () -> ()
    %cst_23 = arith.constant dense<0.000000e+00> : vector<2x8x8xf32>
    %72 = tpu.matmul %69, %70, %cst_23 {dimension_numbers = #tpu.dot_dimension_numbers<[2], [2], [1], [1], [0, 0, 0, 1, 1, 1], [0], [0]>} : vector<2x8x8xf32>, vector<2x8x8xf32>, vector<2x8x8xf32> -> vector<2x8x8xf32>
    "tpu.trace_stop"() : () -> ()
    %cst_24 = arith.constant 0.353553385 : f32
    %73 = vector.broadcast %cst_24 : f32 to vector<2x8x8xf32>
    %74 = arith.mulf %72, %73 : vector<2x8x8xf32>
    %cst_25 = arith.constant dense<0xFF800000> : vector<2x8xf32>
    %75 = vector.multi_reduction <maximumf>, %74, %cst_25 [2] : vector<2x8x8xf32> to vector<2x8xf32>
    %76 = vector.shape_cast %75 : vector<2x8xf32> to vector<2x8x1xf32>
    %77 = vector.broadcast %76 : vector<2x8x1xf32> to vector<2x8x8xf32>
    %78 = arith.subf %74, %77 : vector<2x8x8xf32>
    %79 = math.exp %78 : vector<2x8x8xf32>
    %cst_26 = arith.constant dense<0.000000e+00> : vector<2x8xf32>
    %80 = vector.multi_reduction <add>, %79, %cst_26 [2] : vector<2x8x8xf32> to vector<2x8xf32>
    %81 = vector.shape_cast %80 : vector<2x8xf32> to vector<2x8x1xf32>
    %82 = vector.broadcast %81 : vector<2x8x1xf32> to vector<2x8x8xf32>
    %83 = arith.divf %79, %82 : vector<2x8x8xf32>
    "tpu.trace_start"() <{level = 10 : i32, message = "bqk,bkd->bqd"}> : () -> ()
    %cst_27 = arith.constant dense<0.000000e+00> : vector<2x8x8xf32>
    %84 = tpu.matmul %83, %71, %cst_27 {dimension_numbers = #tpu.dot_dimension_numbers<[2], [1], [1], [2], [0, 0, 0, 1, 1, 2], [0], [0]>} : vector<2x8x8xf32>, vector<2x8x8xf32>, vector<2x8x8xf32> -> vector<2x8x8xf32>
    "tpu.trace_stop"() : () -> ()
    %85 = vector.extract_strided_slice %36 {offsets = [0, 0, 24], sizes = [2, 8, 8], strides = [1, 1, 1]} : vector<2x8x96xf32> to vector<2x8x8xf32>
    %86 = vector.extract_strided_slice %36 {offsets = [0, 0, 56], sizes = [2, 8, 8], strides = [1, 1, 1]} : vector<2x8x96xf32> to vector<2x8x8xf32>
    %87 = vector.extract_strided_slice %36 {offsets = [0, 0, 88], sizes = [2, 8, 8], strides = [1, 1, 1]} : vector<2x8x96xf32> to vector<2x8x8xf32>
    "tpu.trace_start"() <{level = 10 : i32, message = "bqd,bkd->bqk"}> : () -> ()
    %cst_28 = arith.constant dense<0.000000e+00> : vector<2x8x8xf32>
    %88 = tpu.matmul %85, %86, %cst_28 {dimension_numbers = #tpu.dot_dimension_numbers<[2], [2], [1], [1], [0, 0, 0, 1, 1, 1], [0], [0]>} : vector<2x8x8xf32>, vector<2x8x8xf32>, vector<2x8x8xf32> -> vector<2x8x8xf32>
    "tpu.trace_stop"() : () -> ()
    %cst_29 = arith.constant 0.353553385 : f32
    %89 = vector.broadcast %cst_29 : f32 to vector<2x8x8xf32>
    %90 = arith.mulf %88, %89 : vector<2x8x8xf32>
    %cst_30 = arith.constant dense<0xFF800000> : vector<2x8xf32>
    %91 = vector.multi_reduction <maximumf>, %90, %cst_30 [2] : vector<2x8x8xf32> to vector<2x8xf32>
    %92 = vector.shape_cast %91 : vector<2x8xf32> to vector<2x8x1xf32>
    %93 = vector.broadcast %92 : vector<2x8x1xf32> to vector<2x8x8xf32>
    %94 = arith.subf %90, %93 : vector<2x8x8xf32>
    %95 = math.exp %94 : vector<2x8x8xf32>
    %cst_31 = arith.constant dense<0.000000e+00> : vector<2x8xf32>
    %96 = vector.multi_reduction <add>, %95, %cst_31 [2] : vector<2x8x8xf32> to vector<2x8xf32>
    %97 = vector.shape_cast %96 : vector<2x8xf32> to vector<2x8x1xf32>
    %98 = vector.broadcast %97 : vector<2x8x1xf32> to vector<2x8x8xf32>
    %99 = arith.divf %95, %98 : vector<2x8x8xf32>
    "tpu.trace_start"() <{level = 10 : i32, message = "bqk,bkd->bqd"}> : () -> ()
    %cst_32 = arith.constant dense<0.000000e+00> : vector<2x8x8xf32>
    %100 = tpu.matmul %99, %87, %cst_32 {dimension_numbers = #tpu.dot_dimension_numbers<[2], [1], [1], [2], [0, 0, 0, 1, 1, 2], [0], [0]>} : vector<2x8x8xf32>, vector<2x8x8xf32>, vector<2x8x8xf32> -> vector<2x8x8xf32>
    "tpu.trace_stop"() : () -> ()
    %101 = tpu.concatenate %52, %68, %84, %100 in 2 : vector<2x8x8xf32>, vector<2x8x8xf32>, vector<2x8x8xf32>, vector<2x8x8xf32> -> vector<2x8x32xf32>
    %102 = vector.shape_cast %101 : vector<2x8x32xf32> to vector<16x32xf32>
    %c0_33 = arith.constant 0 : index
    %c0_34 = arith.constant 0 : index
    %103 = vector.load %arg4[%c0_33, %c0_34] : memref<32x32xf32, #tpu.memory_space<vmem>>, vector<32x32xf32>
    %cst_35 = arith.constant dense<0.000000e+00> : vector<16x32xf32>
    %104 = tpu.matmul %102, %103, %cst_35 {dimension_numbers = #tpu.dot_dimension_numbers<[1], [0], [0], [1], [0, 0, 1, 1], [], []>} : vector<16x32xf32>, vector<32x32xf32>, vector<16x32xf32> -> vector<16x32xf32>
    %105 = arith.addf %0, %104 : vector<16x32xf32>
    %c0_36 = arith.constant 0 : index
    %c0_37 = arith.constant 0 : index
    %106 = vector.load %arg5[%c0_36, %c0_37] : memref<1x32xf32, #tpu.memory_space<vmem>>, vector<1x32xf32>
    %107 = vector.broadcast %106 : vector<1x32xf32> to vector<16x32xf32>
    %108 = arith.addf %105, %107 : vector<16x32xf32>
    %cst_38 = arith.constant dense<0.000000e+00> : vector<16xf32>
    %109 = vector.multi_reduction <add>, %108, %cst_38 [1] : vector<16x32xf32> to vector<16xf32>
    %110 = vector.shape_cast %109 : vector<16xf32> to vector<16x1xf32>
    %cst_39 = arith.constant 3.200000e+01 : f32
    %111 = vector.broadcast %cst_39 : f32 to vector<16x1xf32>
    %112 = arith.divf %110, %111 : vector<16x1xf32>
    %113 = arith.mulf %108, %108 : vector<16x32xf32>
    %cst_40 = arith.constant dense<0.000000e+00> : vector<16xf32>
    %114 = vector.multi_reduction <add>, %113, %cst_40 [1] : vector<16x32xf32> to vector<16xf32>
    %115 = vector.shape_cast %114 : vector<16xf32> to vector<16x1xf32>
    %cst_41 = arith.constant 3.200000e+01 : f32
    %116 = vector.broadcast %cst_41 : f32 to vector<16x1xf32>
    %117 = arith.divf %115, %116 : vector<16x1xf32>
    %118 = arith.mulf %112, %112 : vector<16x1xf32>
    %119 = arith.subf %117, %118 : vector<16x1xf32>
    %cst_42 = arith.constant 1.03225803 : f32
    %120 = vector.broadcast %cst_42 : f32 to vector<16x1xf32>
    %121 = arith.mulf %119, %120 : vector<16x1xf32>
    %cst_43 = arith.constant 0.000000e+00 : f32
    %122 = vector.broadcast %cst_43 : f32 to vector<16x1xf32>
    %123 = arith.maximumf %121, %122 : vector<16x1xf32>
    %124 = math.sqrt %123 : vector<16x1xf32>
    %125 = vector.broadcast %112 : vector<16x1xf32> to vector<16x32xf32>
    %126 = arith.subf %108, %125 : vector<16x32xf32>
    %127 = vector.broadcast %3 : f32 to vector<16x32xf32>
    %128 = arith.mulf %127, %126 : vector<16x32xf32>
    %cst_44 = arith.constant 9.99999997E-7 : f32
    %129 = vector.broadcast %cst_44 : f32 to vector<16x1xf32>
    %130 = arith.addf %124, %129 : vector<16x1xf32>
    %131 = vector.broadcast %130 : vector<16x1xf32> to vector<16x32xf32>
    %132 = arith.divf %128, %131 : vector<16x32xf32>
    %133 = vector.broadcast %4 : f32 to vector<16x32xf32>
    %134 = arith.addf %132, %133 : vector<16x32xf32>
    %c0_45 = arith.constant 0 : index
    %c0_46 = arith.constant 0 : index
    %135 = vector.load %arg6[%c0_45, %c0_46] : memref<32x64xf32, #tpu.memory_space<vmem>>, vector<32x64xf32>
    %cst_47 = arith.constant dense<0.000000e+00> : vector<16x64xf32>
    %136 = tpu.matmul %134, %135, %cst_47 {dimension_numbers = #tpu.dot_dimension_numbers<[1], [0], [0], [1], [0, 0, 1, 1], [], []>} : vector<16x32xf32>, vector<32x64xf32>, vector<16x64xf32> -> vector<16x64xf32>
    %c0_48 = arith.constant 0 : index
    %c0_49 = arith.constant 0 : index
    %137 = vector.load %arg7[%c0_48, %c0_49] : memref<1x64xf32, #tpu.memory_space<vmem>>, vector<1x64xf32>
    %138 = vector.broadcast %137 : vector<1x64xf32> to vector<16x64xf32>
    %139 = arith.addf %136, %138 : vector<16x64xf32>
    %cst_50 = arith.constant 0.000000e+00 : f32
    %140 = vector.broadcast %cst_50 : f32 to vector<16x64xf32>
    %141 = arith.maximumf %139, %140 : vector<16x64xf32>
    %c0_51 = arith.constant 0 : index
    %c0_52 = arith.constant 0 : index
    %142 = vector.load %arg8[%c0_51, %c0_52] : memref<64x32xf32, #tpu.memory_space<vmem>>, vector<64x32xf32>
    %cst_53 = arith.constant dense<0.000000e+00> : vector<16x32xf32>
    %143 = tpu.matmul %141, %142, %cst_53 {dimension_numbers = #tpu.dot_dimension_numbers<[1], [0], [0], [1], [0, 0, 1, 1], [], []>} : vector<16x64xf32>, vector<64x32xf32>, vector<16x32xf32> -> vector<16x32xf32>
    %c0_54 = arith.constant 0 : index
    %c0_55 = arith.constant 0 : index
    %144 = vector.load %arg9[%c0_54, %c0_55] : memref<1x32xf32, #tpu.memory_space<vmem>>, vector<1x32xf32>
    %145 = vector.broadcast %144 : vector<1x32xf32> to vector<16x32xf32>
    %146 = arith.addf %143, %145 : vector<16x32xf32>
    %147 = arith.addf %108, %146 : vector<16x32xf32>
    %c0_56 = arith.constant 0 : index
    %c0_57 = arith.constant 0 : index
    %148 = vector.load %arg10[%c0_56, %c0_57] : memref<16x32xf32, #tpu.memory_space<vmem>>, vector<16x32xf32>
    tpu.vector_store %arg10[%c0_56, %c0_57], %147 {strides = array<i32>} : memref<16x32xf32, #tpu.memory_space<vmem>>, vector<16x32xf32>,
    return
  }
}

</mosaic_0001>

<bundles_post_ra>
// kernel: tpu_custom_call.1
= control target key start
LH: loop header
LB: loop body
LE: loop exit
PB: predicated region body
PF: predicated region fallthrough
CT: control target
= control target key end

     0   :  { %15 = vsyncpa [#allocation5], 0  ;;  %s1652_s0 = inlined_call_operand.hbm [shape: f32[4], index: 0, kind: input, shape index: {}]   ;;  %s1653_s1 = inlined_call_operand.hbm [shape: f32[16,32], index: 1, kind: input, shape index: {}]   ;;  %s1654_s2 = inlined_call_operand.vmem [shape: f32[32,96], index: 2, kind: input, shape index: {}]   ;;  %s1655_s3 = inlined_call_operand.vmem [shape: f32[1,96], index: 3, kind: input, shape index: {}]   ;;  %s1656_s4 = inlined_call_operand.vmem [shape: f32[32,32], index: 4, kind: input, shape index: {}]   ;;  %s1657_s5 = inlined_call_operand.vmem [shape: f32[1,32], index: 5, kind: input, shape index: {}]   ;;  %s1658_s6 = inlined_call_operand.vmem [shape: f32[32,64], index: 6, kind: input, shape index: {}]   ;;  %s1659_s7 = inlined_call_operand.vmem [shape: f32[1,64], index: 7, kind: input, shape index: {}]   ;;  %s1660_s8 = inlined_call_operand.vmem [shape: f32[64,32], index: 8, kind: input, shape index: {}]   ;;  %s1661_s9 = inlined_call_operand.vmem [shape: f32[1,32], index: 9, kind: input, shape index: {}]   ;;  %s1662_s10 = inlined_call_operand.hbm [shape: f32[16,32], index: 10, kind: output, shape index: {}]  }
   0x1   :  { %16 = vsyncpa [#allocation3], 0 }
   0x2   :  { %17 = vsyncpa [#allocation4], 0  ;;  %s23_s15 = sshll.u32 %s1652_s0, 4  ;;  %s31_s18 = sshll.u32 %s1653_s1, 4  ;;  %s24_s15 = int_to_ptr.hbm [resolvable:$true] %s23_s15  ;;  %s32_s18 = int_to_ptr.hbm [resolvable:$true] %s31_s18 }
   0x3   :  { %s1279_s19 = smov [#allocation2]   ;;  %s1280_s20 = smov [#allocation6]  }
   0x4   :  { %26 = dma.hbm_to_smem %s24_s15, 16, %s1279_s19, [#allocation5]  }
   0x5   :  { %s33_s21 = sshll.u32 %s1280_s20, 4  ;;  %s1281_s22 = smov 128   ;;  %s34_s21 = int_to_ptr.vmem [resolvable:$true] %s33_s21 }
   0x6   :  { %s1282_s23 = smov 8  }
   0x7   :  { %39 = dma.hbm_to_vmem [thread:$0]  %s32_s18, 256, %s34_s21, [#allocation3], %s1281_s22, %s1281_s22, %s1282_s23  }
   0x8   :  { %1273 = dma.done.wait [#allocation5], 16  }
   0x9   :  { %1274 = vsyncadd [#allocation5], 4294967280 }
   0xa   :  { %1275 = dma.done.wait [#allocation3], 256  }
   0xb   :  { %1276 = vsyncadd [#allocation3], 4294967040 }
   0xc   :  { %64 = sfence }
   0xd   :  { %v1362_v0 = vld [vmem:[#allocation6] sm:$0xff]  ;;  %vm71_vm0 = vcmask 261120   ;;  %v1283_v4 = vmov 32.0   ;;  %v172_v12 = vld [vmem:[%s1654_s2 + $0x18] sm:$0xff]  ;;  %v171_v13 = vld [vmem:[%s1654_s2 + $0x10] sm:$0xff]  ;;  %s1387_s30 = sld [smem:[#allocation2 + $0x1]] }
   0xe   :  { %v72_v1 = vsel %vm71_vm0, %v1362_v0, 0.0  ;;  %v87_v2 = vmul.f32 %v1362_v0, %v1362_v0  ;;  %1163 = vrcp.f32 %v1283_v4  ;;  %195 = vmatpush.msra.mxu0 %v172_v12  ;;  %v170_v14 = vld [vmem:[%s1654_s2 + $0x8] sm:$0xff]  ;;  %v169_v16 = vld [vmem:[%s1654_s2] sm:$0xff]  ;;  %s1385_s2 = sld [smem:[#allocation2]]  ;;  %s1284_s13 = smov 64   ;;  %vm209_vm8 = vcmask 64512  }
   0xf   :  { %73 = vadd.xlane.f32.xlu0 %v72_v1  ;;  %v1400_v50 = vld [vmem:[%s1655_s3] ss:$0 sm:$0xff]  ;;  %s1285_s14 = smov 96   ;;  %v1409_v53 = vld [vmem:[#allocation6 + $0x8] sm:$0xff]  ;;  %s1286_s3 = smov 80  }
  0x10   :  { %v89_v3 = vsel %vm71_vm0, %v87_v2, 0.0  ;;  %196 = vmatpush.msra.mxu0 %v171_v13  ;;  %v88_v54 = vmul.f32 %v1409_v53, %v1409_v53  ;;  %v75_v56 = vsel %vm71_vm0, %v1409_v53, 0.0  ;;  %s1287_s15 = smov 72   ;;  %s1288_s16 = smov 120  }
  0x11   :  { %s1289_s17 = smov 88   ;;  %s1290_s18 = smov 112  }
  0x12   :  { %197 = vmatpush.msra.mxu0 %v170_v14  ;;  %v92_v55 = vsel %vm71_vm0, %v88_v54, 0.0  ;;  %s1291_s19 = smov 104   ;;  %s1292_s20 = smov 56  }
  0x13   :  { %v166_v47 = vstv %s1387_s30  ;;  %93 = vadd.xlane.f32.xlu2 %v92_v55  ;;  %s1293_s21 = smov 40   ;;  %s1294_s0 = smov 48  }
  0x14   :  { %v1164_v5 = vpop.eup %1163  ;;  %198 = vmatpush.msra.mxu0 %v169_v16  ;;  %v131_v41 = vstv %s1385_s2  ;;  %s1295_s1 = smov 16   ;;  %s1296_s24 = smov 24  }
  0x15   :  { %v79_v6 = vmul.f32 32.0, %v1164_v5  ;;  %vm83_vm1 = vweird.f32 %v1164_v5  ;;  %s1612_s26 = sld [smem:[#allocation2 + $0x2]] }
  0x16   :  { %s1617_s29 = sld [smem:[#allocation2 + $0x3]] }
  0x17   :  { %90 = vadd.xlane.f32.xlu0 %v89_v3  ;;  %v80_v7 = vsub.f32 1.0, %v79_v6 }
  0x19   :  { %v81_v8 = vmul.f32 %v1164_v5, %v80_v7 }
  0x1b   :  { %v82_v9 = vadd.f32 %v1164_v5, %v81_v8 }
  0x1d   :  { %v1369_v11 = vsel %vm83_vm1, %v1164_v5, %v82_v9 }
  0x82   :  { %v74_v10 = vpop.xlane.xlu0 %73 }
  0x83   :  { %v85_v15 = vmul.f32 %v1369_v11, %v74_v10 }
  0x85   :  { %v97_v18 = vmul.f32 %v85_v15, %v85_v15  ;;  %v129_v38 = vsub.f32 %v1362_v0, %v85_v15 }
  0x86   :  { %v94_v59 = vpop.xlane.xlu2 %93 }
  0x87   :  { %v132_v44 = vmul.f32 %v131_v41, %v129_v38  ;;  %v96_v62 = vmul.f32 %v94_v59, %v1369_v11 }
  0x8a   :  { %v91_v17 = vpop.xlane.xlu0 %90 }
  0x8b   :  { %v95_v19 = vmul.f32 %v91_v17, %v1369_v11 }
  0x8d   :  { %v99_v20 = vsub.f32 %v95_v19, %v97_v18 }
  0x8f   :  { %v101_v21 = vmul.f32 1.032258, %v99_v20 }
  0x91   :  { %v103_v22 = vmax.f32 %v101_v21, 0.0 }
  0x93   :  { %1165 = vrsqrt.f32 %v103_v22  ;;  %vm112_vm2 = vcmp.eq.f32.partialorder %v103_v22, inf  ;;  %v115_v30 = vand.u32 2147483648, %v103_v22  ;;  %vm114_vm3 = vcmp.eq.f32.partialorder %v103_v22, 0.0 }
  0x99   :  { %v1166_v23 = vpop.eup %1165 }
  0x9a   :  { %v106_v24 = vmul.f32 %v1166_v23, %v103_v22 }
  0x9c   :  { %v107_v25 = vmul.f32 %v1166_v23, %v106_v24 }
  0x9e   :  { %v108_v26 = vmul.f32 0.5, %v107_v25 }
  0xa0   :  { %v109_v27 = vsub.f32 1.5, %v108_v26 }
  0xa2   :  { %v110_v28 = vmul.f32 %v1166_v23, %v109_v27 }
  0xa4   :  { %v111_v29 = vmul.f32 %v110_v28, %v103_v22 }
  0xa6   :  { %v113_v31 = vsel %vm112_vm2, %v103_v22, %v111_v29 }
  0xa7   :  { %v116_v32 = vsel %vm114_vm3, %v115_v30, %v113_v31 }
  0xa8   :  { %v134_v33 = vadd.f32 1e-06, %v116_v32 }
  0xaa   :  { %1167 = vrcp.f32 %v134_v33  ;;  %v147_v37 = vand.u32 2147483648, %v134_v33  ;;  %v145_v40 = vand.u32 2147483647, %v134_v33  ;;  %vm141_vm5 = vweird.f32 %v134_v33 }
  0xac   :  { %v148_v43 = vor.u32 1.1754944e-38, %v147_v37  ;;  %vm146_vm7 = vcmp.eq.f32.partialorder %v145_v40, 8.507059e+37 }
  0xb0   :  { %v1168_v34 = vpop.eup %1167 }
  0xb1   :  { %v137_v35 = vmul.f32 %v1168_v34, %v134_v33  ;;  %vm142_vm4 = vweird.f32 %v1168_v34 }
  0xb2   :  { %vm143_vm6 = vmor %vm141_vm5, %vm142_vm4 }
  0xb3   :  { %v138_v36 = vsub.f32 1.0, %v137_v35 }
  0xb5   :  { %v139_v39 = vmul.f32 %v1168_v34, %v138_v36 }
  0xb7   :  { %v140_v42 = vadd.f32 %v1168_v34, %v139_v39 }
  0xb9   :  { %v144_v45 = vsel %vm143_vm6, %v1168_v34, %v140_v42 }
  0xba   :  { %v149_v46 = vsel %vm146_vm7, %v148_v43, %v144_v45 }
  0xbb   :  { %v150_v48 = vmul.f32 %v149_v46, %v132_v44 }
  0xbd   :  { %v167_v49 = vadd.f32 %v166_v47, %v150_v48 }
  0xbf   :  { %1108 = vmatmul.msk.f32.vlgmr.msra.gmra.mxu0 %vm71_vm0, %v167_v49 }
 0x13c   :  { %v200_v51 = vpop.f32.mrf.mxu0 }
 0x13d   :  { %v1403_v52 = vadd.f32 %v1400_v50, %v200_v51 }
 0x13f   :  { %311 = vrot.lane.b32.xlu0 %v1403_v52, %s1284_s13  ;;  %207 = vrot.lane.b32.xlu1 %v1403_v52, %s1285_s14 }
 0x169   :  { %76 = vadd.xlane.f32.xlu1 %v75_v56 }
 0x182   :  { %523 = vrot.lane.b32.xlu1 %v1403_v52, %s1286_s3 }
 0x1b1   :  { %v312_v57 = vpop.permute.xlu0 %311  ;;  %v208_v58 = vpop.permute.xlu1 %207 }
 0x1b2   :  { %1110 = vmatpush.xpose.msk.msra.mxu1 %vm209_vm8, %v208_v58 }
 0x1b5   :  { %1111 = vmatmul.msk.f32.vlgmr.msra.gmra.mxu1 %vm209_vm8, %v1403_v52 }
 0x1b6   :  { %332 = vmatpush.msrb.mxu1 %v312_v57 }
 0x1dc   :  { %v77_v60 = vpop.xlane.xlu1 %76 }
 0x1dd   :  { %v86_v61 = vmul.f32 %v1369_v11, %v77_v60 }
 0x1df   :  { %v98_v63 = vmul.f32 %v86_v61, %v86_v61  ;;  %v130_v20 = vsub.f32 %v1409_v53, %v86_v61 }
 0x1e1   :  { %v100_v1 = vsub.f32 %v96_v62, %v98_v63  ;;  %v133_v25 = vmul.f32 %v131_v41, %v130_v20 }
 0x1e3   :  { %v102_v2 = vmul.f32 1.032258, %v100_v1 }
 0x1e5   :  { %v104_v3 = vmax.f32 %v102_v2, 0.0 }
 0x1e7   :  { %1169 = vrsqrt.f32 %v104_v3  ;;  %vm124_vm9 = vcmp.eq.f32.partialorder %v104_v3, inf  ;;  %v127_v12 = vand.u32 2147483648, %v104_v3  ;;  %vm126_vm10 = vcmp.eq.f32.partialorder %v104_v3, 0.0 }
 0x1ed   :  { %v1170_v4 = vpop.eup %1169 }
 0x1ee   :  { %v118_v5 = vmul.f32 %v1170_v4, %v104_v3 }
 0x1f0   :  { %v119_v6 = vmul.f32 %v1170_v4, %v118_v5 }
 0x1f2   :  { %v120_v7 = vmul.f32 0.5, %v119_v6 }
 0x1f4   :  { %v121_v8 = vsub.f32 1.5, %v120_v7  ;;  %v524_v42 = vpop.permute.xlu1 %523 }
 0x1f6   :  { %v122_v9 = vmul.f32 %v1170_v4, %v121_v8 }
 0x1f8   :  { %v123_v10 = vmul.f32 %v122_v9, %v104_v3 }
 0x1fa   :  { %v125_v13 = vsel %vm124_vm9, %v104_v3, %v123_v10 }
 0x1fb   :  { %v128_v14 = vsel %vm126_vm10, %v127_v12, %v125_v13 }
 0x1fc   :  { %v135_v15 = vadd.f32 1e-06, %v128_v14 }
 0x1fe   :  { %1171 = vrcp.f32 %v135_v15  ;;  %v162_v19 = vand.u32 2147483648, %v135_v15  ;;  %v160_v22 = vand.u32 2147483647, %v135_v15  ;;  %vm156_vm12 = vweird.f32 %v135_v15 }
 0x200   :  { %v163_v24 = vor.u32 1.1754944e-38, %v162_v19  ;;  %vm161_vm14 = vcmp.eq.f32.partialorder %v160_v22, 8.507059e+37 }
 0x204   :  { %v1172_v16 = vpop.eup %1171 }
 0x205   :  { %v152_v17 = vmul.f32 %v1172_v16, %v135_v15  ;;  %vm157_vm11 = vweird.f32 %v1172_v16 }
 0x206   :  { %vm158_vm13 = vmor %vm156_vm12, %vm157_vm11 }
 0x207   :  { %v153_v18 = vsub.f32 1.0, %v152_v17 }
 0x209   :  { %v154_v21 = vmul.f32 %v1172_v16, %v153_v18 }
 0x20b   :  { %v155_v23 = vadd.f32 %v1172_v16, %v154_v21 }
 0x20d   :  { %v159_v26 = vsel %vm158_vm13, %v1172_v16, %v155_v23 }
 0x20e   :  { %v164_v27 = vsel %vm161_vm14, %v163_v24, %v159_v26 }
 0x20f   :  { %v165_v28 = vmul.f32 %v164_v27, %v133_v25 }
 0x211   :  { %v168_v29 = vadd.f32 %v166_v47, %v165_v28 }
 0x213   :  { %1109 = vmatmul.msk.f32.gmra.mxu0 %vm71_vm0, %v168_v29 }
 0x232   :  { %v231_v30 = vpop.f32.mrf.mxu1 }
 0x233   :  { %v261_v31 = vmul.f32 0.35355338, %v231_v30 }
 0x235   :  { %v263_v32 = vsel %vm209_vm8, %v261_v31, -inf }
 0x236   :  { %264 = vmax.xlane.f32.xlu2 %v263_v32 }
 0x290   :  { %v203_v33 = vpop.f32.mrf.mxu0 }
 0x291   :  { %v1431_v34 = vadd.f32 %v1400_v50, %v203_v33 }
 0x293   :  { %709 = vrot.lane.b32.xlu1 %v1431_v34, %s1287_s15  ;;  %391 = vrot.lane.b32.xlu0 %v1431_v34, %s1288_s16 }
 0x294   :  { %235 = vrot.lane.b32.xlu2 %v1431_v34, %s1285_s14 }
 0x29b   :  { %363 = vrot.lane.b32.xlu0 %v1403_v52, %s1288_s16 }
 0x29c   :  { %393 = vrot.lane.b32.xlu2 %v1431_v34, %s1289_s17 }
 0x2a4   :  { %365 = vrot.lane.b32.xlu2 %v1403_v52, %s1289_s17 }
 0x2a9   :  { %v265_v35 = vpop.xlane.xlu2 %264 }
 0x2aa   :  { %v269_v36 = vsub.f32 %v261_v31, %v265_v35 }
 0x2ac   :  { %521 = vrot.lane.b32.xlu2 %v1403_v52, %s1290_s18  ;;  %v271_v37 = vmul.f32 1.442695, %v269_v36 }
 0x2ae   :  { %1173 = vpow2.f32 %v271_v37 }
 0x2b4   :  { %679 = vrot.lane.b32.xlu2 %v1403_v52, %s1291_s19  ;;  %v1174_v38 = vpop.eup %1173 }
 0x2b5   :  { %v275_v39 = vsel %vm209_vm8, %v1174_v38, 0.0 }
 0x2bc   :  { %549 = vrot.lane.b32.xlu2 %v1431_v34, %s1290_s18  ;;  %s1091_s18 = sshll.u32 %s1662_s10, 4  ;;  %s1092_s18 = int_to_ptr.hbm [resolvable:$true] %s1091_s18 }
 0x2c5   :  { %276 = vadd.xlane.f32.xlu0 %v275_v39 }
 0x2d9   :  { %681 = vrot.lane.b32.xlu0 %v1403_v52, %s1287_s15 }
 0x2e1   :  { %551 = vrot.lane.b32.xlu0 %v1431_v34, %s1286_s3 }
 0x2e9   :  { %707 = vrot.lane.b32.xlu0 %v1431_v34, %s1291_s19 }
 0x2ee   :  { %v236_v40 = vpop.permute.xlu2 %235 }
 0x2ef   :  { %1112 = vmatpush.xpose.msk.msra.mxu2 %vm209_vm8, %v236_v40 }
 0x2f2   :  { %1113 = vmatmul.msk.f32.vlgmr.msra.gmra.mxu2 %vm209_vm8, %v1431_v34 }
 0x2f6   :  { %v394_v41 = vpop.permute.xlu2 %393 }
 0x2f7   :  { %1118 = vmatpush.xpose.msk.msrb.mxu2 %vm209_vm8, %v394_v41 }
 0x2fb   :  { %1122 = vmatpush.xpose.msk.msra.mxu2 %vm209_vm8, %v524_v42 }
 0x2fe   :  { %v366_v43 = vpop.permute.xlu2 %365 }
 0x2ff   :  { %1116 = vmatpush.xpose.msk.msra.mxu1 %vm209_vm8, %v366_v43 }
 0x305   :  { %v392_v44 = vpop.permute.xlu0 %391  ;;  %v710_v1 = vpop.permute.xlu1 %709 }
 0x306   :  { %1119 = vmatmul.msk.f32.vlgmr.msrb.gmra.mxu2 %vm209_vm8, %v392_v44  ;;  %v522_v45 = vpop.permute.xlu2 %521 }
 0x30d   :  { %v364_v46 = vpop.permute.xlu0 %363 }
 0x30e   :  { %1123 = vmatmul.msk.f32.vlgmr.msra.gmra.mxu2 %vm209_vm8, %v522_v45  ;;  %v680_v62 = vpop.permute.xlu2 %679 }
 0x316   :  { %v550_v2 = vpop.permute.xlu2 %549 }
 0x338   :  { %v277_v47 = vpop.xlane.xlu0 %276 }
 0x339   :  { %1175 = vrcp.f32 %v277_v47  ;;  %v292_v51 = vand.u32 2147483648, %v277_v47  ;;  %v290_v55 = vand.u32 2147483647, %v277_v47  ;;  %vm286_vm1 = vweird.f32 %v277_v47 }
 0x33b   :  { %v293_v57 = vor.u32 1.1754944e-38, %v292_v51  ;;  %vm291_vm3 = vcmp.eq.f32.partialorder %v290_v55, 8.507059e+37 }
 0x33f   :  { %v1176_v48 = vpop.eup %1175 }
 0x340   :  { %v282_v49 = vmul.f32 %v1176_v48, %v277_v47  ;;  %vm287_vm15 = vweird.f32 %v1176_v48 }
 0x341   :  { %vm288_vm2 = vmor %vm286_vm1, %vm287_vm15 }
 0x342   :  { %v283_v50 = vsub.f32 1.0, %v282_v49 }
 0x344   :  { %v284_v54 = vmul.f32 %v1176_v48, %v283_v50 }
 0x346   :  { %v285_v56 = vadd.f32 %v1176_v48, %v284_v54 }
 0x348   :  { %v289_v58 = vsel %vm288_vm2, %v1176_v48, %v285_v56 }
 0x349   :  { %v294_v59 = vsel %vm291_vm3, %v293_v57, %v289_v58 }
 0x34a   :  { %v295_v60 = vmul.f32 %v1174_v38, %v294_v59 }
 0x34b   :  { %v682_v61 = vpop.permute.xlu0 %681 }
 0x34c   :  { %1114 = vmatmul.msk.f32.vlgmr.msrb.gmra.mxu1 %vm209_vm8, %v295_v60  ;;  %1128 = vmatpush.xpose.msk.msrb.mxu2 %vm209_vm8, %v682_v61 }
 0x34f   :  { %1129 = vmatmul.msk.f32.vlgmr.msrb.gmra.mxu2 %vm209_vm8, %v680_v62 }
 0x353   :  { %v552_v63 = vpop.permute.xlu0 %551 }
 0x354   :  { %1117 = vmatmul.msk.f32.vlgmr.msra.gmra.mxu1 %vm209_vm8, %v364_v46  ;;  %1124 = vmatpush.xpose.msk.msrb.mxu0 %vm209_vm8, %v552_v63 }
 0x357   :  { %1125 = vmatmul.msk.f32.vlgmr.msrb.gmra.mxu0 %vm209_vm8, %v550_v2 }
 0x358   :  { %1130 = vmatpush.xpose.msk.msra.mxu0 %vm209_vm8, %v710_v1 }
 0x35b   :  { %v708_v3 = vpop.permute.xlu0 %707 }
 0x35f   :  { %1131 = vmatmul.msk.f32.vlgmr.msra.gmra.mxu0 %vm209_vm8, %v708_v3 }
 0x375   :  { %v258_v4 = vpop.f32.mrf.mxu2 }
 0x376   :  { %v262_v5 = vmul.f32 0.35355338, %v258_v4 }
 0x378   :  { %v266_v6 = vsel %vm209_vm8, %v262_v5, -inf }
 0x379   :  { %267 = vmax.xlane.f32.xlu2 %v266_v6 }
 0x389   :  { %v416_v7 = vpop.f32.mrf.mxu2 }
 0x38a   :  { %v420_v8 = vmul.f32 0.35355338, %v416_v7 }
 0x38c   :  { %v424_v9 = vsel %vm209_vm8, %v420_v8, -inf }
 0x38d   :  { %425 = vmax.xlane.f32.xlu2 %v424_v9 }
 0x391   :  { %v546_v10 = vpop.f32.mrf.mxu2 }
 0x392   :  { %v577_v12 = vmul.f32 0.35355338, %v546_v10 }
 0x394   :  { %v579_v13 = vsel %vm209_vm8, %v577_v12, -inf }
 0x395   :  { %580 = vmax.xlane.f32.xlu0 %v579_v13 }
 0x3c9   :  { %v1467_v14 = vpop.f32.mrf.mxu1 }
 0x3d1   :  { %v388_v15 = vpop.f32.mrf.mxu1 }
 0x3d2   :  { %v419_v16 = vmul.f32 0.35355338, %v388_v15  ;;  %v704_v19 = vpop.f32.mrf.mxu2 }
 0x3d3   :  { %v735_v22 = vmul.f32 0.35355338, %v704_v19 }
 0x3d4   :  { %v574_v17 = vpop.f32.mrf.mxu0  ;;  %v421_v18 = vsel %vm209_vm8, %v419_v16, -inf }
 0x3d5   :  { %v578_v20 = vmul.f32 0.35355338, %v574_v17  ;;  %422 = vmax.xlane.f32.xlu1 %v421_v18  ;;  %v737_v24 = vsel %vm209_vm8, %v735_v22, -inf }
 0x3d7   :  { %v582_v21 = vsel %vm209_vm8, %v578_v20, -inf }
 0x3d8   :  { %583 = vmax.xlane.f32.xlu0 %v582_v21 }
 0x3dc   :  { %v732_v23 = vpop.f32.mrf.mxu0 }
 0x3dd   :  { %v736_v25 = vmul.f32 0.35355338, %v732_v23  ;;  %738 = vmax.xlane.f32.xlu1 %v737_v24 }
 0x3df   :  { %v740_v26 = vsel %vm209_vm8, %v736_v25, -inf }
 0x3e0   :  { %741 = vmax.xlane.f32.xlu2 %v740_v26 }
 0x3ec   :  { %v268_v27 = vpop.xlane.xlu2 %267 }
 0x3ed   :  { %v270_v28 = vsub.f32 %v262_v5, %v268_v27 }
 0x3ef   :  { %v273_v29 = vmul.f32 1.442695, %v270_v28 }
 0x3f1   :  { %1177 = vpow2.f32 %v273_v29 }
 0x3f7   :  { %v1473_v30 = vpop.eup %1177 }
 0x3f8   :  { %v278_v31 = vsel %vm209_vm8, %v1473_v30, 0.0 }
 0x3f9   :  { %279 = vadd.xlane.f32.xlu1 %v278_v31 }
 0x400   :  { %v426_v32 = vpop.xlane.xlu2 %425 }
 0x401   :  { %v428_v33 = vsub.f32 %v420_v8, %v426_v32 }
 0x403   :  { %v431_v35 = vmul.f32 1.442695, %v428_v33 }
 0x405   :  { %1179 = vpow2.f32 %v431_v35 }
 0x408   :  { %v581_v36 = vpop.xlane.xlu0 %580 }
 0x409   :  { %v585_v37 = vsub.f32 %v577_v12, %v581_v36 }
 0x40b   :  { %v1477_v38 = vpop.eup %1179  ;;  %v587_v39 = vmul.f32 1.442695, %v585_v37 }
 0x40c   :  { %v436_v40 = vsel %vm209_vm8, %v1477_v38, 0.0 }
 0x40d   :  { %1181 = vpow2.f32 %v587_v39  ;;  %437 = vadd.xlane.f32.xlu0 %v436_v40 }
 0x412   :  { %337 = vrot.lane.b32.xlu1 %v1431_v34, %s1284_s13 }
 0x413   :  { %v1483_v41 = vpop.eup %1181 }
 0x414   :  { %v591_v42 = vsel %vm209_vm8, %v1483_v41, 0.0 }
 0x415   :  { %592 = vadd.xlane.f32.xlu2 %v591_v42 }
 0x421   :  { %469 = vrot.lane.b32.xlu0 %v1403_v52, %s1292_s20 }
 0x429   :  { %495 = vrot.lane.b32.xlu0 %v1431_v34, %s1292_s20 }
 0x448   :  { %v423_v43 = vpop.xlane.xlu1 %422 }
 0x449   :  { %v427_v44 = vsub.f32 %v419_v16, %v423_v43 }
 0x44b   :  { %v429_v45 = vmul.f32 1.442695, %v427_v44  ;;  %v584_v46 = vpop.xlane.xlu0 %583 }
 0x44c   :  { %v586_v50 = vsub.f32 %v578_v20, %v584_v46 }
 0x44d   :  { %1183 = vpow2.f32 %v429_v45 }
 0x44e   :  { %v589_v58 = vmul.f32 1.442695, %v586_v50 }
 0x450   :  { %v739_v47 = vpop.xlane.xlu1 %738 }
 0x451   :  { %v743_v48 = vsub.f32 %v735_v22, %v739_v47 }
 0x453   :  { %v1489_v49 = vpop.eup %1183  ;;  %v745_v51 = vmul.f32 1.442695, %v743_v48  ;;  %v742_v54 = vpop.xlane.xlu2 %741 }
 0x454   :  { %v744_v55 = vsub.f32 %v736_v25, %v742_v54  ;;  %v433_v56 = vsel %vm209_vm8, %v1489_v49, 0.0 }
 0x455   :  { %1185 = vpow2.f32 %v745_v51  ;;  %434 = vadd.xlane.f32.xlu0 %v433_v56 }
 0x456   :  { %v747_v57 = vmul.f32 1.442695, %v744_v55 }
 0x458   :  { %1187 = vpow2.f32 %v747_v57 }
 0x459   :  { %1189 = vpow2.f32 %v589_v58 }
 0x45b   :  { %v1493_v59 = vpop.eup %1185 }
 0x45c   :  { %v749_v60 = vsel %vm209_vm8, %v1493_v59, 0.0 }
 0x45d   :  { %750 = vadd.xlane.f32.xlu2 %v749_v60 }
 0x45e   :  { %v1497_v61 = vpop.eup %1187 }
 0x45f   :  { %v752_v62 = vsel %vm209_vm8, %v1497_v61, 0.0  ;;  %v1501_v63 = vpop.eup %1189 }
 0x460   :  { %753 = vadd.xlane.f32.xlu1 %v752_v62  ;;  %v594_v1 = vsel %vm209_vm8, %v1501_v63, 0.0 }
 0x465   :  { %595 = vadd.xlane.f32.xlu2 %v594_v1 }
 0x469   :  { %785 = vrot.lane.b32.xlu0 %v1403_v52, %s1293_s21 }
 0x46c   :  { %v280_v2 = vpop.xlane.xlu1 %279 }
 0x46d   :  { %1191 = vrcp.f32 %v280_v2  ;;  %v307_v8 = vand.u32 2147483648, %v280_v2  ;;  %vm301_vm5 = vweird.f32 %v280_v2  ;;  %v305_v9 = vand.u32 2147483647, %v280_v2 }
 0x46f   :  { %v308_v12 = vor.u32 1.1754944e-38, %v307_v8  ;;  %vm306_vm7 = vcmp.eq.f32.partialorder %v305_v9, 8.507059e+37 }
 0x471   :  { %811 = vrot.lane.b32.xlu0 %v1431_v34, %s1293_s21 }
 0x473   :  { %v1192_v3 = vpop.eup %1191 }
 0x474   :  { %v297_v4 = vmul.f32 %v1192_v3, %v280_v2  ;;  %vm302_vm4 = vweird.f32 %v1192_v3 }
 0x475   :  { %vm303_vm6 = vmor %vm301_vm5, %vm302_vm4 }
 0x476   :  { %v298_v5 = vsub.f32 1.0, %v297_v4 }
 0x478   :  { %v299_v6 = vmul.f32 %v1192_v3, %v298_v5 }
 0x47a   :  { %v300_v7 = vadd.f32 %v1192_v3, %v299_v6 }
 0x47c   :  { %v304_v10 = vsel %vm303_vm6, %v1192_v3, %v300_v7 }
 0x47d   :  { %627 = vrot.lane.b32.xlu2 %v1403_v52, %s1294_s0  ;;  %v309_v15 = vsel %vm306_vm7, %v308_v12, %v304_v10 }
 0x47e   :  { %v310_v17 = vmul.f32 %v1473_v30, %v309_v15 }
 0x480   :  { %v438_v13 = vpop.xlane.xlu0 %437 }
 0x481   :  { %1193 = vrcp.f32 %v438_v13  ;;  %v465_v22 = vand.u32 2147483648, %v438_v13  ;;  %vm459_vm10 = vweird.f32 %v438_v13  ;;  %v463_v23 = vand.u32 2147483647, %v438_v13 }
 0x483   :  { %v466_v26 = vor.u32 1.1754944e-38, %v465_v22  ;;  %vm464_vm12 = vcmp.eq.f32.partialorder %v463_v23, 8.507059e+37 }
 0x484   :  { %v338_v16 = vpop.permute.xlu1 %337 }
 0x485   :  { %358 = vmatpush.msra.mxu3 %v338_v16  ;;  %653 = vrot.lane.b32.xlu2 %v1431_v34, %s1294_s0 }
 0x486   :  { %1115 = vmatmul.msk.f32.vlgmr.msra.gmra.mxu3 %vm209_vm8, %v310_v17 }
 0x487   :  { %v1194_v18 = vpop.eup %1193 }
 0x488   :  { %v455_v19 = vmul.f32 %v1194_v18, %v438_v13  ;;  %vm460_vm9 = vweird.f32 %v1194_v18  ;;  %v593_v29 = vpop.xlane.xlu2 %592 }
 0x489   :  { %vm461_vm11 = vmor %vm459_vm10, %vm460_vm9  ;;  %1195 = vrcp.f32 %v593_v29  ;;  %v608_v55 = vand.u32 2147483648, %v593_v29  ;;  %vm602_vm3 = vweird.f32 %v593_v29  ;;  %v606_v57 = vand.u32 2147483647, %v593_v29 }
 0x48a   :  { %v456_v20 = vsub.f32 1.0, %v455_v19 }
 0x48b   :  { %v609_v3 = vor.u32 1.1754944e-38, %v608_v55  ;;  %vm607_vm5 = vcmp.eq.f32.partialorder %v606_v57, 8.507059e+37 }
 0x48c   :  { %v457_v21 = vmul.f32 %v1194_v18, %v456_v20 }
 0x48e   :  { %v458_v52 = vadd.f32 %v1194_v18, %v457_v21 }
 0x48f   :  { %v1196_v30 = vpop.eup %1195 }
 0x490   :  { %v462_v25 = vsel %vm461_vm11, %v1194_v18, %v458_v52  ;;  %v598_v32 = vmul.f32 %v1196_v30, %v593_v29  ;;  %vm603_vm15 = vweird.f32 %v1196_v30 }
 0x491   :  { %v467_v27 = vsel %vm464_vm12, %v466_v26, %v462_v25  ;;  %vm604_vm4 = vmor %vm602_vm3, %vm603_vm15 }
 0x492   :  { %v468_v34 = vmul.f32 %v1477_v38, %v467_v27  ;;  %v599_v35 = vsub.f32 1.0, %v598_v32 }
 0x493   :  { %v470_v24 = vpop.permute.xlu0 %469 }
 0x494   :  { %490 = vmatpush.msrb.mxu3 %v470_v24  ;;  %v600_v40 = vmul.f32 %v1196_v30, %v599_v35 }
 0x496   :  { %v601_v47 = vadd.f32 %v1196_v30, %v600_v40 }
 0x498   :  { %v605_v62 = vsel %vm604_vm4, %v1196_v30, %v601_v47  ;;  %vm863_vm4 = vcmask 130048  }
 0x499   :  { %v610_v6 = vsel %vm607_vm5, %v609_v3, %v605_v62  ;;  %vm866_vm5 = vcmask 195584  }
 0x49a   :  { %v611_v15 = vmul.f32 %v1483_v41, %v610_v6 }
 0x49b   :  { %v496_v28 = vpop.permute.xlu0 %495 }
 0x49c   :  { %516 = vmatpush.msrb.mxu1 %v496_v28 }
 0x49d   :  { %1121 = vmatmul.msk.f32.vlgmr.msrb.gmra.mxu1 %vm209_vm8, %v468_v34 }
 0x4c8   :  { %v435_v31 = vpop.xlane.xlu0 %434 }
 0x4c9   :  { %1197 = vrcp.f32 %v435_v31  ;;  %v450_v38 = vand.u32 2147483648, %v435_v31  ;;  %v448_v44 = vand.u32 2147483647, %v435_v31  ;;  %vm444_vm14 = vweird.f32 %v435_v31 }
 0x4cb   :  { %v451_v48 = vor.u32 1.1754944e-38, %v450_v38  ;;  %vm449_vm2 = vcmp.eq.f32.partialorder %v448_v44, 8.507059e+37  ;;  %v871_v38 = vld [vmem:[%s1656_s4 + $0x10] sm:$0xff]  ;;  %v870_v44 = vld [vmem:[%s1656_s4 + $0x8] sm:$0xff] }
 0x4cf   :  { %v1198_v33 = vpop.eup %1197 }
 0x4d0   :  { %v440_v36 = vmul.f32 %v1198_v33, %v435_v31  ;;  %v751_v37 = vpop.xlane.xlu2 %750  ;;  %vm445_vm13 = vweird.f32 %v1198_v33 }
 0x4d1   :  { %1199 = vrcp.f32 %v751_v37  ;;  %vm446_vm1 = vmor %vm444_vm14, %vm445_vm13  ;;  %vm760_vm7 = vweird.f32 %v751_v37  ;;  %v766_v16 = vand.u32 2147483648, %v751_v37 }
 0x4d2   :  { %v441_v39 = vsub.f32 1.0, %v440_v36 }
 0x4d3   :  { %v1513_v42 = vpop.xlane.xlu1 %753  ;;  %v767_v22 = vor.u32 1.1754944e-38, %v766_v16 }
 0x4d4   :  { %v442_v43 = vmul.f32 %v1198_v33, %v441_v39  ;;  %1201 = vrcp.f32 %v1513_v42  ;;  %v781_v27 = vand.u32 2147483648, %v1513_v42  ;;  %v779_v29 = vand.u32 2147483647, %v1513_v42 }
 0x4d6   :  { %v443_v45 = vadd.f32 %v1198_v33, %v442_v43  ;;  %vm780_vm3 = vcmp.eq.f32.partialorder %v779_v29, 8.507059e+37 }
 0x4d7   :  { %v1200_v46 = vpop.eup %1199 }
 0x4d8   :  { %v756_v50 = vmul.f32 %v1200_v46, %v751_v37  ;;  %v596_v51 = vpop.xlane.xlu2 %595  ;;  %v447_v54 = vsel %vm446_vm1, %v1198_v33, %v443_v45  ;;  %vm761_vm6 = vweird.f32 %v1200_v46  ;;  %vm775_vm1 = vweird.f32 %v1513_v42  ;;  %v869_v45 = vld [vmem:[%s1656_s4] sm:$0xff] }
 0x4d9   :  { %1203 = vrcp.f32 %v596_v51  ;;  %v452_v60 = vsel %vm449_vm2, %v451_v48, %v447_v54  ;;  %v623_v17 = vand.u32 2147483648, %v596_v51  ;;  %v621_v20 = vand.u32 2147483647, %v596_v51  ;;  %vm762_vm10 = vmor %vm760_vm7, %vm761_vm6 }
 0x4da   :  { %v1516_v56 = vpop.eup %1201  ;;  %v757_v58 = vsub.f32 1.0, %v756_v50  ;;  %v453_v2 = vmul.f32 %v1489_v49, %v452_v60  ;;  %v764_v49 = vand.u32 2147483647, %v751_v37  ;;  %vm617_vm11 = vweird.f32 %v596_v51 }
 0x4db   :  { %v771_v1 = vmul.f32 %v1516_v56, %v1513_v42  ;;  %v786_v7 = vpop.permute.xlu0 %785  ;;  %v624_v23 = vor.u32 1.1754944e-38, %v623_v17  ;;  %vm776_vm14 = vweird.f32 %v1516_v56  ;;  %vm622_vm15 = vcmp.eq.f32.partialorder %v621_v20, 8.507059e+37 }
 0x4dc   :  { %v758_v4 = vmul.f32 %v1200_v46, %v757_v58  ;;  %1120 = vmatmul.msk.f32.vlgmr.msrb.gmra.mxu3 %vm209_vm8, %v453_v2  ;;  %vm765_vm12 = vcmp.eq.f32.partialorder %v764_v49, 8.507059e+37  ;;  %vm777_vm2 = vmor %vm775_vm1, %vm776_vm14  ;;  %v782_v33 = vor.u32 1.1754944e-38, %v781_v27 }
 0x4dd   :  { %v772_v8 = vsub.f32 1.0, %v771_v1  ;;  %v1160_v1 = vld [vmem:[%s1657_s5] ss:$0 sm:$0xff] }
 0x4de   :  { %v759_v12 = vadd.f32 %v1200_v46, %v758_v4 }
 0x4df   :  { %v1204_v5 = vpop.eup %1203  ;;  %v773_v18 = vmul.f32 %v1516_v56, %v772_v8 }
 0x4e0   :  { %v613_v9 = vmul.f32 %v1204_v5, %v596_v51  ;;  %v628_v10 = vpop.permute.xlu2 %627  ;;  %vm618_vm9 = vweird.f32 %v1204_v5  ;;  %v763_v21 = vsel %vm762_vm10, %v1200_v46, %v759_v12 }
 0x4e1   :  { %648 = vmatpush.msra.mxu3 %v628_v10  ;;  %vm619_vm13 = vmor %vm617_vm11, %vm618_vm9  ;;  %v774_v41 = vadd.f32 %v1516_v56, %v773_v18  ;;  %v768_v26 = vsel %vm765_vm12, %v767_v22, %v763_v21  ;;  %v1003_v18 = vld [vmem:[%s1658_s6 + $0x18] sm:$0xff]  ;;  %v1001_v21 = vld [vmem:[%s1658_s6 + $0x8] sm:$0xff] }
 0x4e2   :  { %v614_v13 = vsub.f32 1.0, %v613_v9  ;;  %v769_v32 = vmul.f32 %v1493_v59, %v768_v26  ;;  %1026 = vmatpush.msrb.mxu0 %v1003_v18 }
 0x4e3   :  { %806 = vmatpush.msrb.mxu3 %v786_v7  ;;  %v812_v34 = vpop.permute.xlu0 %811  ;;  %v778_v31 = vsel %vm777_vm2, %v1516_v56, %v774_v41 }
 0x4e4   :  { %v615_v19 = vmul.f32 %v1204_v5, %v614_v13  ;;  %1126 = vmatmul.msk.f32.vlgmr.msra.gmra.mxu3 %vm209_vm8, %v611_v15  ;;  %v783_v35 = vsel %vm780_vm3, %v782_v33, %v778_v31  ;;  %vm1051_vm3 = vcmask 523264  }
 0x4e5   :  { %v784_v36 = vmul.f32 %v1497_v61, %v783_v35  ;;  %v872_v61 = vld [vmem:[%s1656_s4 + $0x18] sm:$0xff] }
 0x4e6   :  { %v616_v52 = vadd.f32 %v1204_v5, %v615_v19  ;;  %891 = vmatpush.msra.mxu2 %v872_v61  ;;  %v1002_v19 = vld [vmem:[%s1658_s6 + $0x10] sm:$0xff]  ;;  %v1046_v61 = vld [vmem:[%s1660_s8 + $0x38] sm:$0xff] }
 0x4e7   :  { %1027 = vmatpush.msrb.mxu0 %v1002_v19  ;;  %1066 = vmatpush.msra.mxu3 %v1046_v61 }
 0x4e8   :  { %v620_v24 = vsel %vm619_vm13, %v1204_v5, %v616_v52  ;;  %v654_v25 = vpop.permute.xlu2 %653  ;;  %892 = vmatpush.msra.mxu2 %v871_v38  ;;  %v1045_v38 = vld [vmem:[%s1660_s8 + $0x30] sm:$0xff] }
 0x4e9   :  { %v625_v28 = vsel %vm622_vm15, %v624_v23, %v620_v24  ;;  %674 = vmatpush.msra.mxu1 %v654_v25  ;;  %v1000_v23 = vld [vmem:[%s1658_s6] sm:$0xff]  ;;  %1028 = vmatpush.msrb.mxu0 %v1001_v21 }
 0x4ea   :  { %v626_v30 = vmul.f32 %v1501_v63, %v625_v28  ;;  %893 = vmatpush.msra.mxu2 %v870_v44  ;;  %1067 = vmatpush.msra.mxu3 %v1045_v38 }
 0x4eb   :  { %832 = vmatpush.msrb.mxu1 %v812_v34  ;;  %1029 = vmatpush.msrb.mxu0 %v1000_v23 }
 0x4ec   :  { %1127 = vmatmul.msk.f32.vlgmr.msra.gmra.mxu1 %vm209_vm8, %v626_v30  ;;  %1132 = vmatmul.msk.f32.vlgmr.msrb.gmra.mxu3 %vm209_vm8, %v769_v32 }
 0x4ed   :  { %894 = vmatpush.msra.mxu2 %v869_v45  ;;  %v1044_v45 = vld [vmem:[%s1660_s8 + $0x28] sm:$0xff] }
 0x4ee   :  { %1068 = vmatpush.msra.mxu3 %v1044_v45 }
 0x4f4   :  { %1133 = vmatmul.msk.f32.vlgmr.msrb.gmra.mxu1 %vm209_vm8, %v784_v36 }
 0x509   :  { %v360_v37 = vpop.f32.mrf.mxu3 }
 0x51a   :  { %v518_v39 = vpop.f32.mrf.mxu1 }
 0x55f   :  { %v492_v40 = vpop.f32.mrf.mxu3 }
 0x560   :  { %839 = vrot.lane.b32.xlu2 %v492_v40, %s1282_s23 }
 0x567   :  { %v650_v63 = vpop.f32.mrf.mxu3 }
 0x568   :  { %847 = vrot.lane.b32.xlu0 %v650_v63, %s1295_s1 }
 0x569   :  { %v676_v42 = vpop.f32.mrf.mxu1 }
 0x56a   :  { %849 = vrot.lane.b32.xlu1 %v676_v42, %s1295_s1 }
 0x56f   :  { %v808_v59 = vpop.f32.mrf.mxu3 }
 0x570   :  { %841 = vrot.lane.b32.xlu0 %v518_v39, %s1282_s23  ;;  %855 = vrot.lane.b32.xlu2 %v808_v59, %s1296_s24 }
 0x571   :  { %v834_v43 = vpop.f32.mrf.mxu1 }
 0x578   :  { %857 = vrot.lane.b32.xlu2 %v834_v43, %s1296_s24 }
 0x5ba   :  { %v840_v46 = vpop.permute.xlu2 %839 }
 0x5bb   :  { %v861_v47 = vsel %vm209_vm8, %v1467_v14, %v840_v46 }
 0x5ca   :  { %v856_v48 = vpop.permute.xlu2 %855 }
 0x5d2   :  { %v858_v58 = vpop.permute.xlu2 %857 }
 0x5da   :  { %v848_v50 = vpop.permute.xlu0 %847 }
 0x5db   :  { %v864_v51 = vsel %vm863_vm4, %v861_v47, %v848_v50  ;;  %v1043_v47 = vld [vmem:[%s1660_s8 + $0x20] sm:$0xff] }
 0x5dc   :  { %v867_v54 = vsel %vm866_vm5, %v864_v51, %v856_v48  ;;  %v850_v56 = vpop.permute.xlu1 %849  ;;  %v1042_v51 = vld [vmem:[%s1660_s8 + $0x18] sm:$0xff]  ;;  %1069 = vmatpush.msra.mxu3 %v1043_v47 }
 0x5dd   :  { %1134 = vmatmul.msk.f32.vlgmr.msra.gmra.mxu2 %vm71_vm0, %v867_v54 }
 0x5de   :  { %1070 = vmatpush.msra.mxu3 %v1042_v51 }
 0x5e2   :  { %v842_v55 = vpop.permute.xlu0 %841 }
 0x5e3   :  { %v862_v57 = vsel %vm209_vm8, %v360_v37, %v842_v55 }
 0x5e4   :  { %v865_v60 = vsel %vm863_vm4, %v862_v57, %v850_v56 }
 0x5e5   :  { %v868_v62 = vsel %vm866_vm5, %v865_v60, %v858_v58 }
 0x5e6   :  { %1135 = vmatmul.msk.f32.gmra.mxu2 %vm71_vm0, %v868_v62 }
 0x660   :  { %v896_v14 = vpop.f32.mrf.mxu2 }
 0x661   :  { %v902_v2 = vadd.f32 %v896_v14, %v1362_v0 }
 0x663   :  { %v1561_v3 = vadd.f32 %v1160_v1, %v902_v2 }
 0x665   :  { %v910_v4 = vsel %vm71_vm0, %v1561_v3, 0.0  ;;  %v918_v5 = vmul.f32 %v1561_v3, %v1561_v3 }
 0x666   :  { %911 = vadd.xlane.f32.xlu0 %v910_v4  ;;  %v962_v4 = vstv %s1612_s26 }
 0x667   :  { %v920_v6 = vsel %vm71_vm0, %v918_v5, 0.0 }
 0x668   :  { %921 = vadd.xlane.f32.xlu2 %v920_v6 }
 0x669   :  { %v899_v7 = vpop.f32.mrf.mxu2 }
 0x66a   :  { %v903_v8 = vadd.f32 %v899_v7, %v1409_v53 }
 0x66c   :  { %v1569_v9 = vadd.f32 %v1160_v1, %v903_v8 }
 0x66e   :  { %v913_v0 = vsel %vm71_vm0, %v1569_v9, 0.0  ;;  %v919_v10 = vmul.f32 %v1569_v9, %v1569_v9 }
 0x66f   :  { %914 = vadd.xlane.f32.xlu1 %v913_v0 }
 0x670   :  { %v923_v12 = vsel %vm71_vm0, %v919_v10, 0.0 }
 0x671   :  { %924 = vadd.xlane.f32.xlu0 %v923_v12  ;;  %v997_v12 = vstv %s1617_s29 }
 0x6d9   :  { %v912_v13 = vpop.xlane.xlu0 %911 }
 0x6da   :  { %v1577_v15 = vmul.f32 %v912_v13, %v1369_v11 }
 0x6db   :  { %v922_v49 = vpop.xlane.xlu2 %921 }
 0x6dc   :  { %v928_v53 = vmul.f32 %v1577_v15, %v1577_v15  ;;  %v926_v16 = vmul.f32 %v922_v49, %v1369_v11  ;;  %v960_v1 = vsub.f32 %v1561_v3, %v1577_v15 }
 0x6de   :  { %v930_v17 = vsub.f32 %v926_v16, %v928_v53  ;;  %v963_v8 = vmul.f32 %v962_v4, %v960_v1 }
 0x6e0   :  { %v932_v20 = vmul.f32 1.032258, %v930_v17 }
 0x6e2   :  { %v934_v52 = vmax.f32 %v932_v20, 0.0  ;;  %v915_v22 = vpop.xlane.xlu1 %914 }
 0x6e3   :  { %v1595_v41 = vmul.f32 %v915_v22, %v1369_v11 }
 0x6e4   :  { %1205 = vrsqrt.f32 %v934_v52  ;;  %v925_v24 = vpop.xlane.xlu0 %924  ;;  %vm943_vm8 = vcmp.eq.f32.partialorder %v934_v52, inf  ;;  %v946_v40 = vand.u32 2147483648, %v934_v52  ;;  %vm945_vm6 = vcmp.eq.f32.partialorder %v934_v52, 0.0 }
 0x6e5   :  { %v929_v25 = vmul.f32 %v1595_v41, %v1595_v41  ;;  %v927_v26 = vmul.f32 %v925_v24, %v1369_v11  ;;  %v961_v15 = vsub.f32 %v1569_v9, %v1595_v41  ;;  %v1041_v41 = vld [vmem:[%s1660_s8 + $0x10] sm:$0xff] }
 0x6e6   :  { %1071 = vmatpush.msra.mxu3 %v1041_v41 }
 0x6e7   :  { %v931_v27 = vsub.f32 %v927_v26, %v929_v25  ;;  %v1040_v26 = vld [vmem:[%s1660_s8 + $0x8] sm:$0xff] }
 0x6e8   :  { %1072 = vmatpush.msra.mxu3 %v1040_v26 }
 0x6e9   :  { %v933_v28 = vmul.f32 1.032258, %v931_v27  ;;  %v1039_v27 = vld [vmem:[%s1660_s8] sm:$0xff] }
 0x6ea   :  { %v1206_v34 = vpop.eup %1205  ;;  %1073 = vmatpush.msra.mxu3 %v1039_v27 }
 0x6eb   :  { %v937_v29 = vmul.f32 %v1206_v34, %v934_v52  ;;  %v935_v30 = vmax.f32 %v933_v28, 0.0  ;;  %v1161_v28 = vld [vmem:[%s1659_s7] ss:$0 sm:$0xff]  ;;  %s1297_s7 = smov [#allocation7]  }
 0x6ec   :  { %s1089_s8 = sshll.u32 %s1297_s7, 4  ;;  %s1090_s8 = int_to_ptr.vmem [resolvable:$true] %s1089_s8 }
 0x6ed   :  { %v938_v31 = vmul.f32 %v1206_v34, %v937_v29  ;;  %1207 = vrsqrt.f32 %v935_v30  ;;  %vm955_vm7 = vcmp.eq.f32.partialorder %v935_v30, inf  ;;  %v958_v50 = vand.u32 2147483648, %v935_v30 }
 0x6ee   :  { %vm957_vm9 = vcmp.eq.f32.partialorder %v935_v30, 0.0 }
 0x6ef   :  { %v939_v32 = vmul.f32 0.5, %v938_v31 }
 0x6f1   :  { %v940_v33 = vsub.f32 1.5, %v939_v32 }
 0x6f3   :  { %v1208_v35 = vpop.eup %1207  ;;  %v941_v36 = vmul.f32 %v1206_v34, %v940_v33 }
 0x6f4   :  { %v949_v37 = vmul.f32 %v1208_v35, %v935_v30 }
 0x6f5   :  { %v942_v39 = vmul.f32 %v941_v36, %v934_v52 }
 0x6f6   :  { %v950_v63 = vmul.f32 %v1208_v35, %v949_v37 }
 0x6f7   :  { %v944_v42 = vsel %vm943_vm8, %v934_v52, %v942_v39  ;;  %v964_v52 = vmul.f32 %v962_v4, %v961_v15 }
 0x6f8   :  { %v947_v11 = vsel %vm945_vm6, %v946_v40, %v944_v42  ;;  %v951_v59 = vmul.f32 0.5, %v950_v63 }
 0x6f9   :  { %v965_v43 = vadd.f32 1e-06, %v947_v11 }
 0x6fa   :  { %v952_v44 = vsub.f32 1.5, %v951_v59 }
 0x6fb   :  { %1209 = vrcp.f32 %v965_v43  ;;  %v978_v62 = vand.u32 2147483648, %v965_v43  ;;  %v976_v2 = vand.u32 2147483647, %v965_v43  ;;  %vm972_vm11 = vweird.f32 %v965_v43 }
 0x6fc   :  { %v953_v46 = vmul.f32 %v1208_v35, %v952_v44  ;;  %v1162_v35 = vld [vmem:[%s1661_s9] ss:$0 sm:$0xff] }
 0x6fd   :  { %v979_v6 = vor.u32 1.1754944e-38, %v978_v62  ;;  %vm977_vm13 = vcmp.eq.f32.partialorder %v976_v2, 8.507059e+37 }
 0x6fe   :  { %v954_v48 = vmul.f32 %v953_v46, %v935_v30 }
 0x700   :  { %v956_v54 = vsel %vm955_vm7, %v935_v30, %v954_v48 }
 0x701   :  { %v1210_v55 = vpop.eup %1209  ;;  %v959_v56 = vsel %vm957_vm9, %v958_v50, %v956_v54 }
 0x702   :  { %v968_v57 = vmul.f32 %v1210_v55, %v965_v43  ;;  %v966_v58 = vadd.f32 1e-06, %v959_v56  ;;  %vm973_vm10 = vweird.f32 %v1210_v55 }
 0x703   :  { %vm974_vm12 = vmor %vm972_vm11, %vm973_vm10 }
 0x704   :  { %v969_v60 = vsub.f32 1.0, %v968_v57  ;;  %1211 = vrcp.f32 %v966_v58  ;;  %v993_v17 = vand.u32 2147483648, %v966_v58  ;;  %v991_v19 = vand.u32 2147483647, %v966_v58 }
 0x705   :  { %vm987_vm15 = vweird.f32 %v966_v58 }
 0x706   :  { %v970_v14 = vmul.f32 %v1210_v55, %v969_v60  ;;  %v994_v21 = vor.u32 1.1754944e-38, %v993_v17  ;;  %vm992_vm2 = vcmp.eq.f32.partialorder %v991_v19, 8.507059e+37 }
 0x708   :  { %v971_v5 = vadd.f32 %v1210_v55, %v970_v14 }
 0x70a   :  { %v1212_v7 = vpop.eup %1211  ;;  %v975_v0 = vsel %vm974_vm12, %v1210_v55, %v971_v5 }
 0x70b   :  { %v980_v10 = vsel %vm977_vm13, %v979_v6, %v975_v0  ;;  %v983_v13 = vmul.f32 %v1212_v7, %v966_v58  ;;  %vm988_vm14 = vweird.f32 %v1212_v7 }
 0x70c   :  { %v981_v49 = vmul.f32 %v980_v10, %v963_v8  ;;  %vm989_vm1 = vmor %vm987_vm15, %vm988_vm14 }
 0x70d   :  { %v984_v53 = vsub.f32 1.0, %v983_v13 }
 0x70e   :  { %v998_v16 = vadd.f32 %v997_v12, %v981_v49 }
 0x70f   :  { %v985_v18 = vmul.f32 %v1212_v7, %v984_v53 }
 0x710   :  { %1136 = vmatmul.msk.f32.vlgmr.msrb.gmra.mxu0 %vm71_vm0, %v998_v16 }
 0x711   :  { %v986_v20 = vadd.f32 %v1212_v7, %v985_v18 }
 0x713   :  { %v990_v22 = vsel %vm989_vm1, %v1212_v7, %v986_v20 }
 0x714   :  { %v995_v23 = vsel %vm992_vm2, %v994_v21, %v990_v22 }
 0x715   :  { %v996_v24 = vmul.f32 %v995_v23, %v964_v52 }
 0x717   :  { %v999_v25 = vadd.f32 %v997_v12, %v996_v24 }
 0x719   :  { %1137 = vmatmul.msk.f32.gmra.mxu0 %vm71_vm0, %v999_v25 }
 0x78d   :  { %v1031_v34 = vpop.f32.mrf.mxu0 }
 0x78e   :  { %v1032_v29 = vadd.f32 %v1161_v28, %v1031_v34 }
 0x790   :  { %v1037_v30 = vmax.f32 %v1032_v29, 0.0 }
 0x792   :  { %1138 = vmatmul.msk.f32.vlgmr.msra.gmra.mxu3 %vm1051_vm3, %v1037_v30 }
 0x796   :  { %v1034_v31 = vpop.f32.mrf.mxu0 }
 0x797   :  { %v1035_v32 = vadd.f32 %v1161_v28, %v1034_v31 }
 0x799   :  { %v1038_v33 = vmax.f32 %v1035_v32, 0.0 }
 0x79b   :  { %1139 = vmatmul.msk.f32.gmra.mxu3 %vm1051_vm3, %v1038_v33 }
 0x815   :  { %v1075_v36 = vpop.f32.mrf.mxu3 }
 0x816   :  { %v1076_v37 = vadd.f32 %v1162_v35, %v1075_v36 }
 0x818   :  { %v1081_v39 = vadd.f32 %v1076_v37, %v1561_v3 }
 0x81a   :  { %1083 = vst.msk [vmem:[#allocation7] sm:$0xff] %vm71_vm0, %v1081_v39 }
 0x81e   :  { %v1078_v40 = vpop.f32.mrf.mxu3 }
 0x81f   :  { %v1079_v63 = vadd.f32 %v1162_v35, %v1078_v40 }
 0x821   :  { %v1082_v42 = vadd.f32 %v1079_v63, %v1569_v9 }
 0x823   :  { %1084 = vst.msk [vmem:[#allocation7 + $0x8] sm:$0xff] %vm71_vm0, %v1082_v42 }
 0x824   :  { %1097 = dma.vmem_to_hbm [thread:$0]  %s1090_s8, 256, %s1092_s18, [#allocation4], %s1281_s22, %s1281_s22, %s1282_s23  }
 0x825   :  { %1277 = dma.done.wait [#allocation4], 256  }
 0x826   :  { %1278 = vsyncadd [#allocation4], 4294967040 }
 0x827   :  { %1102 = vsyncpa [#allocation3], 1 }
 0x828   :  { %1103 = vsyncpa [#allocation4], 1 }
 0x829   :  { %1104 = vsyncpa [#allocation5], 1 }

</bundles_post_ra>
